<compile_context>
chip_gen: v6e
topology: v6e:2x2x1
jax: 0.10.0
libtpu: 0.0.40
codegen_flags: <defaults>
</compile_context>

<pallas_src>
import jax
import jax.numpy as jnp
from jax.experimental import pallas as pl
from jax.experimental.pallas import tpu as pltpu

_LANE = 128          # lane width -> keep embed dim a multiple of this
_SUBLANE = 8         # f32 sublane granularity
_HBM_CHUNK = 32      # rows per DMA issue/wait chunk on the HBM-gather path
_VMEM_UNROLL = 8     # row copies unrolled per loop iteration (VMEM path)


def _ceil_to(x, m):
    return ((x + m - 1) // m) * m


# ---------------------------------------------------------------------------
# Kernel 1: VMEM-resident table (small / medium vocab).
# ---------------------------------------------------------------------------
def _gather_vmem_kernel(ids_ref, tbl_ref, out_ref):
    # ids_ref: (N_pad,) int32 in SMEM (scalar prefetch)
    # tbl_ref: (V, E)  full table resident in VMEM (constant block index)
    # out_ref: (T, E)  output block for this token tile
    tokens = out_ref.shape[0]                   # static tile size (mult of 8)
    base = pl.program_id(0) * tokens

    @pl.loop(0, tokens // _VMEM_UNROLL)
    def _(g):
        start = g * _VMEM_UNROLL
        for u in range(_VMEM_UNROLL):           # unrolled: scalar reads + row
            t = start + u                       # copies overlap in the bundle
            row = ids_ref[base + t]             # free scalar read from SMEM
            out_ref[pl.ds(t, 1), :] = tbl_ref[pl.ds(row, 1), :]


# ---------------------------------------------------------------------------
# Kernel 2: HBM row gather (large vocab) — chunked, double-buffered DMA.
# ---------------------------------------------------------------------------
def _gather_hbm_kernel(ids_ref, w_hbm, out_ref, sems):
    # ids_ref: (N_pad,) int32 in SMEM (scalar prefetch)
    # w_hbm:   (V, E) table left in HBM (memory_space=pl.ANY)
    # out_ref: (T, E) output block (T is a multiple of _HBM_CHUNK)
    # sems:    (2,)   DMA semaphores, one per in-flight chunk
    tokens, _ = out_ref.shape
    base = pl.program_id(0) * tokens
    n_chunks = tokens // _HBM_CHUNK

    def issue(c, slot):
        # Issue _HBM_CHUNK single-row DMAs onto sems[slot] (unrolled so scalar
        # reads / descriptor setup overlap with DMA issue).
        for t in range(_HBM_CHUNK):
            tok = c * _HBM_CHUNK + t
            row = ids_ref[base + tok]
            pltpu.make_async_copy(
                w_hbm.at[pl.ds(row, 1), :],
                out_ref.at[pl.ds(tok, 1), :],
                sems.at[slot],
            ).start()

    issue(0, 0)                                  # prologue: chunk 0 in flight

    @pl.loop(0, n_chunks)
    def _(c):
        slot = c % 2

        @pl.when(c + 1 < n_chunks)               # overlap next issue w/ drain
        def _():
            issue(c + 1, 1 - slot)

        # One aggregate wait per chunk: descriptor byte count equals the sum of
        # the chunk's _HBM_CHUNK row copies, so a single wait drains the chunk
        # (removes per-row semaphore waits from the epilogue).
        pltpu.make_async_copy(
            w_hbm.at[pl.ds(0, _HBM_CHUNK), :],
            out_ref.at[pl.ds(0, _HBM_CHUNK), :],
            sems.at[slot],
        ).wait()


# ---------------------------------------------------------------------------
# Wrapper
# ---------------------------------------------------------------------------
def word_embedding(ids, table, *, force_path=None):
    """Embedding lookup matching `one_hot(ids, num_words) @ W.T`.

    ids:   [B, S] integer word ids.
    table: [num_words, embed_dim] -- the nn.Linear weight PRE-TRANSPOSED once
           at parameter setup (f32 or bf16).  Do NOT transpose per call.
    Returns [B, S, embed_dim] in table.dtype.
    """
    B, S = ids.shape
    V, E = table.shape
    dtype = table.dtype
    itemsize = jnp.dtype(dtype).itemsize

    # Lane-dense output: pad embed dim to a multiple of 128 once (setup cost).
    E_pad = _ceil_to(E, _LANE)
    if E_pad != E:
        table = jnp.pad(table, ((0, 0), (0, E_pad - E)))
    row_bytes = E_pad * itemsize

    N = B * S

    # Per-generation VMEM budget (v5e/v6e: 128 MiB physical, v7x: 64 MiB/core).
    try:
        vmem_phys = int(pltpu.get_tpu_info().vmem_capacity_bytes)
    except Exception:
        vmem_phys = 64 << 20                     # conservative (v7x per-core)
    vmem_limit = max(32 << 20, min(100 << 20, vmem_phys - (8 << 20)))

    def pick_tile(target, gran):
        # Cap T so 2x double-buffered output blocks stay well under budget,
        # then balance tiles (keeps n_tiles >= 2 whenever N > target so the
        # "parallel" grid axis feeds both TensorCores on v7x).
        cap = max(gran, ((vmem_limit // 4) // row_bytes) // gran * gran)
        tgt = min(target, cap)
        if N <= tgt:
            return _ceil_to(N, gran)
        tiles = pl.cdiv(N, tgt)
        return _ceil_to(pl.cdiv(N, tiles), gran)

    table_bytes = V * E_pad * itemsize
    t_vmem = pick_tile(1024, _SUBLANE)
    fits_vmem = (2 * table_bytes + 2 * t_vmem * row_bytes + (2 << 20)) <= vmem_limit
    use_vmem_table = fits_vmem if force_path is None else (force_path == "vmem")

    T = t_vmem if use_vmem_table else pick_tile(512, _HBM_CHUNK)
    n_tiles = pl.cdiv(N, T)
    N_pad = n_tiles * T

    # ids -> flat int32 scalars in SMEM; clamp so a stray OOV id cannot address
    # out of bounds (original one-hot produced a zero row for OOV).
    ids_flat = jnp.clip(ids.reshape(-1).astype(jnp.int32), 0, V - 1)
    if N_pad != N:
        ids_flat = jnp.concatenate(
            [ids_flat, jnp.zeros((N_pad - N,), jnp.int32)])

    if use_vmem_table:
        kernel = _gather_vmem_kernel
        in_specs = [pl.BlockSpec((V, E_pad), lambda i, ids: (0, 0))]
        scratch = []
    else:
        kernel = _gather_hbm_kernel
        in_specs = [pl.BlockSpec(memory_space=pl.ANY)]      # table stays in HBM
        scratch = [pltpu.SemaphoreType.DMA((2,))]

    out = pl.pallas_call(
        kernel,
        out_shape=jax.ShapeDtypeStruct((N_pad, E_pad), dtype),
        grid_spec=pltpu.PrefetchScalarGridSpec(
            num_scalar_prefetch=1,                           # ids -> SMEM
            grid=(n_tiles,),                                 # token-tile axis
            in_specs=in_specs,
            out_specs=pl.BlockSpec((T, E_pad), lambda i, ids: (i, 0)),
            scratch_shapes=scratch,
        ),
        compiler_params=pltpu.CompilerParams(
            dimension_semantics=("parallel",),
            vmem_limit_bytes=vmem_limit,
        ),
    )(ids_flat, table)

    return out[:N, :E].reshape(B, S, E)


if __name__ == "__main__":
    key = jax.random.PRNGKey(0)
    k_w, k_ids = jax.random.split(key)

    # Small shapes implied by the module: sentences, words per sentence,
    # vocabulary (num_words) and embedding width (embed_dim).
    B, S = 2, 8
    num_words = 512
    embed_dim = 128

    # nn.Linear(num_words, embed_dim, bias=False) weight, kaiming-uniform-like.
    bound = 1.0 / jnp.sqrt(jnp.float32(num_words))
    weight = jax.random.uniform(k_w, (embed_dim, num_words),
                                dtype=jnp.float32, minval=-bound, maxval=bound)

    # One-time parameter-layout step (NOT in the per-call hot path):
    table = jnp.asarray(weight.T, dtype=jnp.float32)   # [num_words, embed_dim]

    # Deterministic word-id tensor (stand-in for ids_word(word) over sentences).
    ids = jax.random.randint(k_ids, (B, S), 0, num_words, dtype=jnp.int32)

    # Reference: one_hot @ W.T == row gather from the table.
    ref = jnp.take(table, ids.reshape(-1), axis=0).reshape(B, S, embed_dim)

    # Path 1: VMEM-resident table (auto-selected for this 256 KiB table).
    out_vmem = jax.block_until_ready(word_embedding(ids, table))
    assert out_vmem.shape == (B, S, embed_dim)
    assert jnp.array_equal(out_vmem, ref)

    # Path 2: HBM-gather fallback (large-vocab path), forced to exercise it.
    out_hbm = jax.block_until_ready(
        word_embedding(ids, table, force_path="hbm"))
    assert out_hbm.shape == (B, S, embed_dim)
    assert jnp.array_equal(out_hbm, ref)

    print("KERNEL_OK")
</pallas_src>

<mosaic_0001>
module attributes {stable_mosaic.version = 11 : i64} {
  func.func @_gather_vmem_kernel(%arg0: i32, %arg1: memref<16xi32, #tpu.memory_space<smem>>, %arg2: memref<512x128xf32, #tpu.memory_space<vmem>>, %arg3: memref<16x128xf32, #tpu.memory_space<vmem>>) attributes {dimension_semantics = [#tpu.dimension_semantics<parallel>], iteration_bounds = array<i64: 1>, scalar_prefetch = 1 : i64, scratch_operands = 0 : i64, tpu.core_type = #tpu.core_type<tc>, window_params = [{pipeline_mode = #tpu.pipeline_mode<synchronous>, transform_indices = @transform_0, window_bounds = array<i64: 512, 128>}, {transform_indices = @transform_1, window_bounds = array<i64: 16, 128>}]} {
    %c16_i32 = arith.constant 16 : i32
    %0 = arith.muli %arg0, %c16_i32 : i32
    %c0_i32 = arith.constant 0 : i32
    %c2_i32 = arith.constant 2 : i32
    %1 = arith.addi %c0_i32, %c2_i32 : i32
    %c1_i32 = arith.constant 1 : i32
    scf.for %arg4 = %c0_i32 to %1 step %c1_i32  : i32 {
      %c1_i32_1 = arith.constant 1 : i32
      %2 = arith.muli %arg4, %c1_i32_1 : i32
      %c0_i32_2 = arith.constant 0 : i32
      %3 = arith.addi %c0_i32_2, %2 : i32
      %c8_i32 = arith.constant 8 : i32
      %4 = arith.muli %3, %c8_i32 : i32
      %c0_i32_3 = arith.constant 0 : i32
      %5 = arith.addi %4, %c0_i32_3 : i32
      %6 = arith.addi %0, %5 : i32
      %7 = arith.index_cast %6 : i32 to index
      %8 = memref.load %arg1[%7] : memref<16xi32, #tpu.memory_space<smem>>
      %9 = arith.index_cast %8 : i32 to index
      %c0 = arith.constant 0 : index
      %10 = vector.load %arg2[%9, %c0] : memref<512x128xf32, #tpu.memory_space<vmem>>, vector<1x128xf32>
      %11 = arith.index_cast %5 : i32 to index
      %c0_4 = arith.constant 0 : index
      %12 = vector.load %arg3[%11, %c0_4] : memref<16x128xf32, #tpu.memory_space<vmem>>, vector<1x128xf32>
      tpu.vector_store %arg3[%11, %c0_4], %10 {strides = array<i32>} : memref<16x128xf32, #tpu.memory_space<vmem>>, vector<1x128xf32>,
      %c1_i32_5 = arith.constant 1 : i32
      %13 = arith.addi %4, %c1_i32_5 : i32
      %14 = arith.addi %0, %13 : i32
      %15 = arith.index_cast %14 : i32 to index
      %16 = memref.load %arg1[%15] : memref<16xi32, #tpu.memory_space<smem>>
      %17 = arith.index_cast %16 : i32 to index
      %c0_6 = arith.constant 0 : index
      %18 = vector.load %arg2[%17, %c0_6] : memref<512x128xf32, #tpu.memory_space<vmem>>, vector<1x128xf32>
      %19 = arith.index_cast %13 : i32 to index
      %c0_7 = arith.constant 0 : index
      %20 = vector.load %arg3[%19, %c0_7] : memref<16x128xf32, #tpu.memory_space<vmem>>, vector<1x128xf32>
      tpu.vector_store %arg3[%19, %c0_7], %18 {strides = array<i32>} : memref<16x128xf32, #tpu.memory_space<vmem>>, vector<1x128xf32>,
      %c2_i32_8 = arith.constant 2 : i32
      %21 = arith.addi %4, %c2_i32_8 : i32
      %22 = arith.addi %0, %21 : i32
      %23 = arith.index_cast %22 : i32 to index
      %24 = memref.load %arg1[%23] : memref<16xi32, #tpu.memory_space<smem>>
      %25 = arith.index_cast %24 : i32 to index
      %c0_9 = arith.constant 0 : index
      %26 = vector.load %arg2[%25, %c0_9] : memref<512x128xf32, #tpu.memory_space<vmem>>, vector<1x128xf32>
      %27 = arith.index_cast %21 : i32 to index
      %c0_10 = arith.constant 0 : index
      %28 = vector.load %arg3[%27, %c0_10] : memref<16x128xf32, #tpu.memory_space<vmem>>, vector<1x128xf32>
      tpu.vector_store %arg3[%27, %c0_10], %26 {strides = array<i32>} : memref<16x128xf32, #tpu.memory_space<vmem>>, vector<1x128xf32>,
      %c3_i32 = arith.constant 3 : i32
      %29 = arith.addi %4, %c3_i32 : i32
      %30 = arith.addi %0, %29 : i32
      %31 = arith.index_cast %30 : i32 to index
      %32 = memref.load %arg1[%31] : memref<16xi32, #tpu.memory_space<smem>>
      %33 = arith.index_cast %32 : i32 to index
      %c0_11 = arith.constant 0 : index
      %34 = vector.load %arg2[%33, %c0_11] : memref<512x128xf32, #tpu.memory_space<vmem>>, vector<1x128xf32>
      %35 = arith.index_cast %29 : i32 to index
      %c0_12 = arith.constant 0 : index
      %36 = vector.load %arg3[%35, %c0_12] : memref<16x128xf32, #tpu.memory_space<vmem>>, vector<1x128xf32>
      tpu.vector_store %arg3[%35, %c0_12], %34 {strides = array<i32>} : memref<16x128xf32, #tpu.memory_space<vmem>>, vector<1x128xf32>,
      %c4_i32 = arith.constant 4 : i32
      %37 = arith.addi %4, %c4_i32 : i32
      %38 = arith.addi %0, %37 : i32
      %39 = arith.index_cast %38 : i32 to index
      %40 = memref.load %arg1[%39] : memref<16xi32, #tpu.memory_space<smem>>
      %41 = arith.index_cast %40 : i32 to index
      %c0_13 = arith.constant 0 : index
      %42 = vector.load %arg2[%41, %c0_13] : memref<512x128xf32, #tpu.memory_space<vmem>>, vector<1x128xf32>
      %43 = arith.index_cast %37 : i32 to index
      %c0_14 = arith.constant 0 : index
      %44 = vector.load %arg3[%43, %c0_14] : memref<16x128xf32, #tpu.memory_space<vmem>>, vector<1x128xf32>
      tpu.vector_store %arg3[%43, %c0_14], %42 {strides = array<i32>} : memref<16x128xf32, #tpu.memory_space<vmem>>, vector<1x128xf32>,
      %c5_i32 = arith.constant 5 : i32
      %45 = arith.addi %4, %c5_i32 : i32
      %46 = arith.addi %0, %45 : i32
      %47 = arith.index_cast %46 : i32 to index
      %48 = memref.load %arg1[%47] : memref<16xi32, #tpu.memory_space<smem>>
      %49 = arith.index_cast %48 : i32 to index
      %c0_15 = arith.constant 0 : index
      %50 = vector.load %arg2[%49, %c0_15] : memref<512x128xf32, #tpu.memory_space<vmem>>, vector<1x128xf32>
      %51 = arith.index_cast %45 : i32 to index
      %c0_16 = arith.constant 0 : index
      %52 = vector.load %arg3[%51, %c0_16] : memref<16x128xf32, #tpu.memory_space<vmem>>, vector<1x128xf32>
      tpu.vector_store %arg3[%51, %c0_16], %50 {strides = array<i32>} : memref<16x128xf32, #tpu.memory_space<vmem>>, vector<1x128xf32>,
      %c6_i32 = arith.constant 6 : i32
      %53 = arith.addi %4, %c6_i32 : i32
      %54 = arith.addi %0, %53 : i32
      %55 = arith.index_cast %54 : i32 to index
      %56 = memref.load %arg1[%55] : memref<16xi32, #tpu.memory_space<smem>>
      %57 = arith.index_cast %56 : i32 to index
      %c0_17 = arith.constant 0 : index
      %58 = vector.load %arg2[%57, %c0_17] : memref<512x128xf32, #tpu.memory_space<vmem>>, vector<1x128xf32>
      %59 = arith.index_cast %53 : i32 to index
      %c0_18 = arith.constant 0 : index
      %60 = vector.load %arg3[%59, %c0_18] : memref<16x128xf32, #tpu.memory_space<vmem>>, vector<1x128xf32>
      tpu.vector_store %arg3[%59, %c0_18], %58 {strides = array<i32>} : memref<16x128xf32, #tpu.memory_space<vmem>>, vector<1x128xf32>,
      %c7_i32 = arith.constant 7 : i32
      %61 = arith.addi %4, %c7_i32 : i32
      %62 = arith.addi %0, %61 : i32
      %63 = arith.index_cast %62 : i32 to index
      %64 = memref.load %arg1[%63] : memref<16xi32, #tpu.memory_space<smem>>
      %65 = arith.index_cast %64 : i32 to index
      %c0_19 = arith.constant 0 : index
      %66 = vector.load %arg2[%65, %c0_19] : memref<512x128xf32, #tpu.memory_space<vmem>>, vector<1x128xf32>
      %67 = arith.index_cast %61 : i32 to index
      %c0_20 = arith.constant 0 : index
      %68 = vector.load %arg3[%67, %c0_20] : memref<16x128xf32, #tpu.memory_space<vmem>>, vector<1x128xf32>
      tpu.vector_store %arg3[%67, %c0_20], %66 {strides = array<i32>} : memref<16x128xf32, #tpu.memory_space<vmem>>, vector<1x128xf32>,
    }
    %c2_i32_0 = arith.constant 2 : i32
    return
  }
  func.func @transform_0(%arg0: i32, %arg1: memref<16xi32, #tpu.memory_space<smem>>) -> (i32, i32) {
    %c0_i32 = arith.constant 0 : i32
    %c0_i32_0 = arith.constant 0 : i32
    %c0_i32_1 = arith.constant 0 : i32
    return %c0_i32, %c0_i32_0 : i32, i32
  }
  func.func @transform_1(%arg0: i32, %arg1: memref<16xi32, #tpu.memory_space<smem>>) -> (i32, i32) {
    %c0_i32 = arith.constant 0 : i32
    %c0_i32_0 = arith.constant 0 : i32
    return %arg0, %c0_i32 : i32, i32
  }
}

</mosaic_0001>

<bundles_post_ra>
// kernel: tpu_custom_call.1
= control target key start
LH: loop header
LB: loop body
LE: loop exit
PB: predicated region body
PF: predicated region fallthrough
CT: control target
= control target key end

     0   :  { %s234_s9 = smov [#allocation3]   ;;  %s278_s0 = inlined_call_operand.hbm [shape: s32[16], index: 0, kind: input, shape index: {}]   ;;  %s279_s1 = inlined_call_operand.hbm [shape: f32[512,128], index: 1, kind: input, shape index: {}]   ;;  %s280_s2 = inlined_call_operand.hbm [shape: f32[16,128], index: 2, kind: output, shape index: {}]  }
   0x1   :  { %8 = dma.hbm_to_smem %s278_s0, 16, %s234_s9, [#allocation2] }
   0x2   :  { %224 = dma.done.wait [#allocation2], 16 }
   0x3   :  { %225 = vsyncadd [#allocation2], 4294967280 }
   0x4   :  { %10 = sfence }
   0x5   :  { %11 = vsyncpa [#allocation5], 0 }
   0x6   :  { %12 = vsyncpa [#allocation6], 0  ;;  %s235_s12 = smov [#allocation4]  }
   0x7   :  { %s18_s13 = sshll.u32 %s235_s12, 4  ;;  %s19_s13 = int_to_ptr.vmem [resolvable:$true] %s18_s13 }
   0x8   :  { %s188_s14 = scalar_lea.vmem %s19_s13, 8192  ;;  %p193_p1 = scmp.lt.s32.totalorder %s19_s13, %s19_s13 }
   0x9   :  { %p189_p0 = scmp.ne.s32.totalorder %s19_s13, %s188_s14  ;;  %p194_p2 = scmp.lt.s32.totalorder %s188_s14, %s188_s14 }
   0xb   :  { %p195_p3 = por %p194_p2, %p193_p1 }
   0xd   :  { %p196_p4 = pnand %p195_p3, %p189_p0 }
   0xf   :  { %199 = shalt.err (!%p196_p4)
}
  0x10   :  { %s236_s15 = smov 128   ;;  %s237_s16 = smov 8  }
  0x11   :  { %24 = dma.hbm_to_vmem [thread:$0]  %s279_s1, 8192, %s19_s13, [#allocation5], %s236_s15, %s236_s15, %s237_s16  }
  0x12   :  { %226 = dma.done.wait [#allocation5], 8192  }
  0x13   :  { %227 = vsyncadd [#allocation5], 4294959104  ;;  %s263_s18 = smov 0  }
  0x14 LB: > { %s144_s19 = sshll.u32 %s232_s18, 3  ;;  %s34_s18 = sadd.s32 1, %s232_s18   ;;  %s232_s18 = sphi %s263_s18, %s34_s18  }
  0x15   : > { %s37_s20 = sld [smem:[#allocation3 + %s144_s19]]  ;;  %s42_s21 = sadd.s32 1, %s144_s19 }
  0x16   : > { %s49_s22 = sadd.s32 2, %s144_s19  ;;  %s44_s23 = sld [smem:[#allocation3 + %s42_s21]] }
  0x17   : > { %s56_s24 = sadd.s32 3, %s144_s19  ;;  %s51_s25 = sld [smem:[#allocation3 + %s49_s22]] }
  0x18   : > { %s63_s26 = sadd.s32 4, %s144_s19  ;;  %s58_s27 = sld [smem:[#allocation3 + %s56_s24]] }
  0x19   : > { %s70_s1 = sadd.s32 5, %s144_s19  ;;  %s65_s28 = sld [smem:[#allocation3 + %s63_s26]] }
  0x1a   : > { %s77_s29 = sadd.s32 6, %s144_s19  ;;  %s72_s30 = sld [smem:[#allocation3 + %s70_s1]] }
  0x1b   : > { %s38_s3 = scalar_lea.vmem [#allocation4], %s37_s20  ;;  %s79_s4 = sld [smem:[#allocation3 + %s77_s29]] }
  0x1c   : > { %v39_v0 = vld [vmem:[%s38_s3] sm:$0x1]  ;;  %s84_s5 = sadd.s32 7, %s144_s19  ;;  %s40_s6 = scalar_lea.vmem [#allocation7], %s144_s19 }
  0x1d   : > { %41 = vst [vmem:[%s40_s6] sm:$0x1] %v39_v0  ;;  %s86_s7 = sld [smem:[#allocation3 + %s84_s5]]  ;;  %s45_s8 = scalar_lea.vmem [#allocation4], %s44_s23 }
  0x1e   : > { %v46_v1 = vld [vmem:[%s45_s8] sm:$0x1]  ;;  %s52_s9 = scalar_lea.vmem [#allocation4], %s51_s25  ;;  %s59_s10 = scalar_lea.vmem [#allocation4], %s58_s27 }
  0x1f   : > { %146 = vst [vmem:[%s40_s6 + $0x1] sm:$0x1] %v46_v1  ;;  %v53_v2 = vld [vmem:[%s52_s9] sm:$0x1]  ;;  %s66_s11 = scalar_lea.vmem [#allocation4], %s65_s28  ;;  %p31_p5 = scmp.ge.s32.totalorder %s34_s18, 2  }
  0x20   : > { %148 = vst [vmem:[%s40_s6 + $0x2] sm:$0x1] %v53_v2  ;;  %v60_v3 = vld [vmem:[%s59_s10] sm:$0x1]  ;;  %s73_s12 = scalar_lea.vmem [#allocation4], %s72_s30  ;;  %s238_s0 = smov (%p31_p5), [#allocation7]  }
  0x21   : > { %150 = vst [vmem:[%s40_s6 + $0x3] sm:$0x1] %v60_v3  ;;  %v67_v4 = vld [vmem:[%s66_s11] sm:$0x1]  ;;  %s80_s13 = scalar_lea.vmem [#allocation4], %s79_s4  ;;  %33 = sbr.rel (!%p31_p5) target bundleno = 20 (0x14), region = 51 }
  0x22   : > { %152 = vst [vmem:[%s40_s6 + $0x4] sm:$0x1] %v67_v4  ;;  %v74_v5 = vld [vmem:[%s73_s12] sm:$0x1]  ;;  %s96_s17 = sshll.u32 (%p31_p5), %s238_s0, 4  ;;  %s97_s17 = int_to_ptr.vmem [resolvable:$true] %s96_s17 }
  0x23   : > { %154 = vst [vmem:[%s40_s6 + $0x5] sm:$0x1] %v74_v5  ;;  %v81_v6 = vld [vmem:[%s80_s13] sm:$0x1]  ;;  %s87_s14 = scalar_lea.vmem [#allocation4], %s86_s7  ;;  %s200_s19 = scalar_lea.vmem (%p31_p5), %s97_s17, 256 }
  0x24   : > { %156 = vst [vmem:[%s40_s6 + $0x6] sm:$0x1] %v81_v6  ;;  %v88_v7 = vld [vmem:[%s87_s14] sm:$0x1]  ;;  %p201_p6 = scmp.ne.s32.totalorder (%p31_p5), %s97_s17, %s200_s19  ;;  %p205_p7 = scmp.lt.s32.totalorder (%p31_p5), %s97_s17, %s97_s17 }
  0x25   : > { %158 = vst [vmem:[%s40_s6 + $0x7] sm:$0x1] %v88_v7  ;;  %p206_p8 = scmp.lt.s32.totalorder (%p31_p5), %s200_s19, %s200_s19 }
  0x27   :  { %p207_p9 = por %p206_p8, %p205_p7 }
  0x29   :  { %p208_p10 = pnand %p207_p9, %p201_p6 }
  0x2b   :  { %211 = shalt.err (!%p208_p10)
}
  0x2c   :  { %102 = dma.vmem_to_hbm [thread:$0]  %s97_s17, 256, %s280_s2, [#allocation6], %s236_s15, %s236_s15, %s237_s16  }
  0x2d   :  { %228 = dma.done.wait [#allocation6], 256  }
  0x2e   :  { %229 = vsyncadd [#allocation6], 4294967040 }
  0x2f   :  { %106 = vsyncpa [#allocation5], 1 }
  0x30   :  { %107 = vsyncpa [#allocation6], 1 }

</bundles_post_ra>
